<compile_context>
chip_gen: v7x
topology: tpu7x:2x2x1
jax: 0.10.0
libtpu: 0.0.40
codegen_flags: <defaults>
</compile_context>

<pallas_src>
import jax
import jax.numpy as jnp
from jax.experimental import pallas as pl
from jax.experimental.pallas import tpu as pltpu


def _lora_linear_kernel(x_ref, w_ref, b_ref, xa_ref, bmat_ref, o_ref, acc_ref):
    k = pl.program_id(2)            # K (in_features) reduction index
    nk = pl.num_programs(2)

    # Frozen linear path: x_tile (tm, tk) @ w_tile (tk, tn); weight was
    # pre-transposed to [in, out] in the wrapper so the MXU sees a plain dot.
    partial = jnp.dot(x_ref[...], w_ref[...],
                      preferred_element_type=jnp.float32)

    # First K step: seed accumulator with bias fused into the same write.
    @pl.when(k == 0)
    def _():
        acc_ref[...] = partial + b_ref[...].astype(jnp.float32)

    @pl.when(k > 0)
    def _():
        acc_ref[...] += partial

    # Final K step: apply the (tiny) LoRA up-projection for this tile & store.
    @pl.when(k == nk - 1)
    def _():
        lora = jnp.dot(xa_ref[...], bmat_ref[...],
                       preferred_element_type=jnp.float32)
        o_ref[...] = (acc_ref[...] + lora).astype(o_ref.dtype)


def _nbytes(shape, dtype):
    n = 1
    for s in shape:
        n *= int(s)
    return n * jnp.dtype(dtype).itemsize


def _choose_k_tiling(in_features, block_k):
    """Return (tk, padded_k): tk divides padded_k exactly.

    Zero padding along K is reduction-safe (padded rows/cols contribute 0)."""
    if in_features <= block_k:
        return in_features, in_features
    if in_features % block_k == 0:
        return block_k, in_features
    # Largest lane-friendly (multiple-of-128) divisor of in_features <= block_k.
    cand = (block_k // 128) * 128
    while cand >= 256:
        if in_features % cand == 0:
            return cand, in_features
        cand -= 128
    # Fall back: zero-pad K up to a multiple of block_k.
    padded = pl.cdiv(in_features, block_k) * block_k
    return block_k, padded


def _vmem_cap_bytes():
    try:
        cap = int(pltpu.get_tpu_info().vmem_capacity_bytes)
        if cap > 0:
            return cap
    except Exception:
        pass
    return 64 * 1024 * 1024   # conservative (v7x per-TC) fallback


def lora_linear(x, weight, bias, lora_A, lora_B, *,
                block_m=512, block_n=512, block_k=1024,
                compute_dtype=jnp.bfloat16):
    """x: [..., in_features]; weight: [out, in] (PyTorch convention);
    bias: [out]; lora_A: [in, rank]; lora_B: [rank, out]."""
    *lead, in_features = x.shape
    out_features, in_w = weight.shape
    assert in_w == in_features
    rank = lora_A.shape[1]
    out_dtype = x.dtype

    x2 = x.reshape(-1, in_features)
    M = x2.shape[0]

    tm = min(block_m, M)
    tn = min(block_n, out_features)
    tk, padded_k = _choose_k_tiling(in_features, block_k)

    # bf16 operands for the MXU (no-ops if already bf16), f32 bias / accum.
    xc = x2.astype(compute_dtype)
    wc = weight.T.astype(compute_dtype)          # fused transpose+cast -> [in, out]
    ac = lora_A.astype(compute_dtype)
    bc = lora_B.astype(compute_dtype)
    b2 = bias.reshape(1, out_features).astype(jnp.float32)

    # Hoisted LoRA down-projection (tiny: O(M*K*rank) flops), bf16 for the MXU.
    xa = jnp.dot(xc, ac, preferred_element_type=jnp.float32).astype(compute_dtype)

    # Zero-pad the reduction axis if needed (reduction-safe).
    k_pad = padded_k - in_features
    if k_pad:
        xc = jnp.pad(xc, ((0, 0), (0, k_pad)))
        wc = jnp.pad(wc, ((0, k_pad), (0, 0)))

    grid = (pl.cdiv(M, tm), pl.cdiv(out_features, tn), padded_k // tk)

    # VMEM budget: double-buffered pipelined operands + persistent scratch,
    # 2x headroom, capped at ~75% of this generation's physical VMEM.
    rank_pad = max(rank, 128)
    tile_bytes = (
        2 * _nbytes((tm, tk), compute_dtype)              # x tile
        + 2 * _nbytes((tk, tn), compute_dtype)            # weight tile
        + 2 * _nbytes((8, max(tn, 128)), jnp.float32)     # bias tile (padded)
        + 2 * _nbytes((tm, rank_pad), compute_dtype)      # xa tile (lane padded)
        + 2 * _nbytes((8, tn), compute_dtype)             # B tile (sublane padded)
        + 2 * _nbytes((tm, tn), out_dtype)                # output tile
        + _nbytes((tm, tn), jnp.float32)                  # acc scratch
    )
    vmem_limit = int(min(max(2 * tile_bytes, 4 * 1024 * 1024),
                         int(0.75 * _vmem_cap_bytes())))

    # Advisory cost estimate so XLA schedules the surrounding casts around us.
    cost = pl.CostEstimate(
        flops=2 * M * in_features * out_features
              + 2 * M * in_features * rank
              + 2 * M * rank * out_features,
        transcendentals=0,
        bytes_accessed=(
            _nbytes((M, padded_k), compute_dtype)
            + _nbytes((padded_k, out_features), compute_dtype)
            + _nbytes((M, rank), compute_dtype)
            + _nbytes((rank, out_features), compute_dtype)
            + _nbytes((out_features,), jnp.float32)
            + _nbytes((M, out_features), out_dtype)),
    )

    out = pl.pallas_call(
        _lora_linear_kernel,
        out_shape=jax.ShapeDtypeStruct((M, out_features), out_dtype),
        grid_spec=pltpu.PrefetchScalarGridSpec(
            num_scalar_prefetch=0,
            grid=grid,
            in_specs=[
                pl.BlockSpec((tm, tk), lambda i, j, k: (i, k)),       # x
                pl.BlockSpec((tk, tn), lambda i, j, k: (k, j)),       # W [in,out]
                pl.BlockSpec((1, tn), lambda i, j, k: (0, j)),        # bias
                pl.BlockSpec((tm, rank), lambda i, j, k: (i, 0)),     # xa = x @ A
                pl.BlockSpec((rank, tn), lambda i, j, k: (0, j)),     # B
            ],
            out_specs=pl.BlockSpec((tm, tn), lambda i, j, k: (i, j)),
            scratch_shapes=[
                pltpu.VMEM((tm, tn), jnp.float32),     # acc
            ],
        ),
        compiler_params=pltpu.CompilerParams(
            # xa is an input now, so both M and N tiles are independent:
            # megacore can shard either axis (matters on v7x's 2 TCs).
            dimension_semantics=("parallel", "parallel", "arbitrary"),
            vmem_limit_bytes=vmem_limit,
        ),
        cost_estimate=cost,
    )(xc, wc, b2, xa, bc)

    return out.reshape(*lead, out_features)


def _reference(x, weight, bias, lora_A, lora_B, compute_dtype=jnp.bfloat16):
    """Pure-JAX reference with the same bf16-operand / f32-accumulate math."""
    *lead, in_features = x.shape
    xb = x.reshape(-1, in_features).astype(compute_dtype)
    wb = weight.astype(compute_dtype)
    ab = lora_A.astype(compute_dtype)
    bb = lora_B.astype(compute_dtype)
    orig = jnp.dot(xb, wb.T, preferred_element_type=jnp.float32) + bias
    xa = jnp.dot(xb, ab, preferred_element_type=jnp.float32)
    lora = jnp.dot(xa.astype(compute_dtype), bb,
                   preferred_element_type=jnp.float32)
    out = (orig + lora).astype(x.dtype)
    return out.reshape(*lead, weight.shape[0])


if __name__ == "__main__":
    key = jax.random.PRNGKey(0)
    k_x, k_w, k_b, k_a, k_bm = jax.random.split(key, 5)

    # Small, lane-dense shapes (multiples of 128 on the feature dims).
    batch, seq = 2, 8
    in_features, out_features, rank = 128, 128, 8

    x = jax.random.normal(k_x, (batch, seq, in_features), dtype=jnp.float32)

    # Frozen nn.Linear parameters (deterministic synthetic init).
    weight = jax.random.normal(k_w, (out_features, in_features),
                               dtype=jnp.float32) * 0.1
    bias = jax.random.normal(k_b, (out_features,), dtype=jnp.float32) * 0.1

    # LoRA params per module __init__: A ~ N(0, 1), B = zeros.
    lora_A = jax.random.normal(k_a, (in_features, rank), dtype=jnp.float32)
    lora_B = jnp.zeros((rank, out_features), dtype=jnp.float32)

    y = lora_linear(x, weight, bias, lora_A, lora_B)
    y = jax.block_until_ready(y)
    ref = _reference(x, weight, bias, lora_A, lora_B)
    assert y.shape == (batch, seq, out_features)
    assert jnp.allclose(y, ref, atol=1e-2, rtol=1e-2)

    # Extra check with a non-zero B so the LoRA path is actually exercised
    # (the module initializes B to zeros, which would make it a no-op).
    lora_B_nz = jax.random.normal(k_bm, (rank, out_features),
                                  dtype=jnp.float32) * 0.05
    y2 = jax.block_until_ready(
        lora_linear(x, weight, bias, lora_A, lora_B_nz))
    ref2 = _reference(x, weight, bias, lora_A, lora_B_nz)
    assert jnp.allclose(y2, ref2, atol=1e-2, rtol=1e-2)

    print("KERNEL_OK")
</pallas_src>

<mosaic_0001>
module attributes {stable_mosaic.version = 11 : i64} {
  func.func @_lora_linear_kernel(%arg0: i32, %arg1: i32, %arg2: i32, %arg3: memref<16x128xbf16, #tpu.memory_space<vmem>>, %arg4: memref<128x128xbf16, #tpu.memory_space<vmem>>, %arg5: memref<1x128xf32, #tpu.memory_space<vmem>>, %arg6: memref<16x8xbf16, #tpu.memory_space<vmem>>, %arg7: memref<8x128xbf16, #tpu.memory_space<vmem>>, %arg8: memref<16x128xf32, #tpu.memory_space<vmem>>, %arg9: memref<16x128xf32, #tpu.memory_space<vmem>>) attributes {dimension_semantics = [#tpu.dimension_semantics<parallel>, #tpu.dimension_semantics<parallel>, #tpu.dimension_semantics<arbitrary>], iteration_bounds = array<i64: 1, 1, 1>, scalar_prefetch = 0 : i64, scratch_operands = 1 : i64, tpu.core_type = #tpu.core_type<tc>, window_params = [{transform_indices = @transform_0, window_bounds = array<i64: 16, 128>}, {transform_indices = @transform_1, window_bounds = array<i64: 128, 128>}, {transform_indices = @transform_2, window_bounds = array<i64: 1, 128>}, {transform_indices = @transform_3, window_bounds = array<i64: 16, 8>}, {transform_indices = @transform_4, window_bounds = array<i64: 8, 128>}, {transform_indices = @transform_5, window_bounds = array<i64: 16, 128>}]} {
    %c0 = arith.constant 0 : index
    %c0_0 = arith.constant 0 : index
    %0 = vector.load %arg3[%c0, %c0_0] : memref<16x128xbf16, #tpu.memory_space<vmem>>, vector<16x128xbf16>
    %c0_1 = arith.constant 0 : index
    %c0_2 = arith.constant 0 : index
    %1 = vector.load %arg4[%c0_1, %c0_2] : memref<128x128xbf16, #tpu.memory_space<vmem>>, vector<128x128xbf16>
    %cst = arith.constant dense<0.000000e+00> : vector<16x128xf32>
    %2 = tpu.matmul %0, %1, %cst {dimension_numbers = #tpu.dot_dimension_numbers<[1], [0], [0], [1], [0, 0, 1, 1], [], []>} : vector<16x128xbf16>, vector<128x128xbf16>, vector<16x128xf32> -> vector<16x128xf32>
    %c0_i32 = arith.constant 0 : i32
    %3 = arith.cmpi eq, %arg2, %c0_i32 : i32
    %4 = arith.extui %3 : i1 to i32
    %c0_i32_3 = arith.constant 0 : i32
    %5 = arith.cmpi ne, %4, %c0_i32_3 : i32
    scf.if %5 {
      %c0_8 = arith.constant 0 : index
      %c0_9 = arith.constant 0 : index
      %12 = vector.load %arg5[%c0_8, %c0_9] : memref<1x128xf32, #tpu.memory_space<vmem>>, vector<1x128xf32>
      %13 = vector.broadcast %12 : vector<1x128xf32> to vector<16x128xf32>
      %14 = arith.addf %2, %13 : vector<16x128xf32>
      %c0_10 = arith.constant 0 : index
      %c0_11 = arith.constant 0 : index
      %15 = vector.load %arg9[%c0_10, %c0_11] : memref<16x128xf32, #tpu.memory_space<vmem>>, vector<16x128xf32>
      tpu.vector_store %arg9[%c0_10, %c0_11], %14 {strides = array<i32>} : memref<16x128xf32, #tpu.memory_space<vmem>>, vector<16x128xf32>,
    } else {
    }
    %c0_i32_4 = arith.constant 0 : i32
    %6 = arith.cmpi sgt, %arg2, %c0_i32_4 : i32
    %7 = arith.extui %6 : i1 to i32
    %c0_i32_5 = arith.constant 0 : i32
    %8 = arith.cmpi ne, %7, %c0_i32_5 : i32
    scf.if %8 {
      %c0_8 = arith.constant 0 : index
      %c0_9 = arith.constant 0 : index
      %12 = vector.load %arg9[%c0_8, %c0_9] : memref<16x128xf32, #tpu.memory_space<vmem>>, vector<16x128xf32>
      %13 = arith.addf %12, %2 : vector<16x128xf32>
      %c0_10 = arith.constant 0 : index
      %c0_11 = arith.constant 0 : index
      %14 = vector.load %arg9[%c0_10, %c0_11] : memref<16x128xf32, #tpu.memory_space<vmem>>, vector<16x128xf32>
      tpu.vector_store %arg9[%c0_10, %c0_11], %13 {strides = array<i32>} : memref<16x128xf32, #tpu.memory_space<vmem>>, vector<16x128xf32>,
    } else {
    }
    %c0_i32_6 = arith.constant 0 : i32
    %9 = arith.cmpi eq, %arg2, %c0_i32_6 : i32
    %10 = arith.extui %9 : i1 to i32
    %c0_i32_7 = arith.constant 0 : i32
    %11 = arith.cmpi ne, %10, %c0_i32_7 : i32
    scf.if %11 {
      %c0_8 = arith.constant 0 : index
      %c0_9 = arith.constant 0 : index
      %12 = vector.load %arg6[%c0_8, %c0_9] : memref<16x8xbf16, #tpu.memory_space<vmem>>, vector<16x8xbf16>
      %c0_10 = arith.constant 0 : index
      %c0_11 = arith.constant 0 : index
      %13 = vector.load %arg7[%c0_10, %c0_11] : memref<8x128xbf16, #tpu.memory_space<vmem>>, vector<8x128xbf16>
      %cst_12 = arith.constant dense<0.000000e+00> : vector<16x128xf32>
      %14 = tpu.matmul %12, %13, %cst_12 {dimension_numbers = #tpu.dot_dimension_numbers<[1], [0], [0], [1], [0, 0, 1, 1], [], []>} : vector<16x8xbf16>, vector<8x128xbf16>, vector<16x128xf32> -> vector<16x128xf32>
      %c0_13 = arith.constant 0 : index
      %c0_14 = arith.constant 0 : index
      %15 = vector.load %arg9[%c0_13, %c0_14] : memref<16x128xf32, #tpu.memory_space<vmem>>, vector<16x128xf32>
      %16 = arith.addf %15, %14 : vector<16x128xf32>
      %c0_15 = arith.constant 0 : index
      %c0_16 = arith.constant 0 : index
      %17 = vector.load %arg8[%c0_15, %c0_16] : memref<16x128xf32, #tpu.memory_space<vmem>>, vector<16x128xf32>
      tpu.vector_store %arg8[%c0_15, %c0_16], %16 {strides = array<i32>} : memref<16x128xf32, #tpu.memory_space<vmem>>, vector<16x128xf32>,
    } else {
    }
    return
  }
  func.func @transform_0(%arg0: i32, %arg1: i32, %arg2: i32) -> (i32, i32) {
    %c0_i32 = arith.constant 0 : i32
    return %arg0, %arg2 : i32, i32
  }
  func.func @transform_1(%arg0: i32, %arg1: i32, %arg2: i32) -> (i32, i32) {
    %c0_i32 = arith.constant 0 : i32
    return %arg2, %arg1 : i32, i32
  }
  func.func @transform_2(%arg0: i32, %arg1: i32, %arg2: i32) -> (i32, i32) {
    %c0_i32 = arith.constant 0 : i32
    %c0_i32_0 = arith.constant 0 : i32
    return %c0_i32, %arg1 : i32, i32
  }
  func.func @transform_3(%arg0: i32, %arg1: i32, %arg2: i32) -> (i32, i32) {
    %c0_i32 = arith.constant 0 : i32
    %c0_i32_0 = arith.constant 0 : i32
    return %arg0, %c0_i32 : i32, i32
  }
  func.func @transform_4(%arg0: i32, %arg1: i32, %arg2: i32) -> (i32, i32) {
    %c0_i32 = arith.constant 0 : i32
    %c0_i32_0 = arith.constant 0 : i32
    return %c0_i32, %arg1 : i32, i32
  }
  func.func @transform_5(%arg0: i32, %arg1: i32, %arg2: i32) -> (i32, i32) {
    %c0_i32 = arith.constant 0 : i32
    return %arg0, %arg1 : i32, i32
  }
}

</mosaic_0001>

<bundles_post_ra>
// kernel: tpu_custom_call.1
= control target key start
LH: loop header
LB: loop body
LE: loop exit
PB: predicated region body
PF: predicated region fallthrough
CT: control target
= control target key end

     0   :  { %10 = vsyncpa [#allocation4], 0  ;;  %s450_s0 = inlined_call_operand.vmem [shape: bf16[16,128], index: 0, kind: input, shape index: {}]   ;;  %s451_s1 = inlined_call_operand.hbm [shape: bf16[128,128], index: 1, kind: input, shape index: {}]   ;;  %s452_s2 = inlined_call_operand.vmem [shape: f32[1,128], index: 2, kind: input, shape index: {}]   ;;  %s453_s3 = inlined_call_operand.vmem [shape: bf16[16,8], index: 3, kind: input, shape index: {}]   ;;  %s454_s4 = inlined_call_operand.vmem [shape: bf16[8,128], index: 4, kind: input, shape index: {}]   ;;  %s455_s5 = inlined_call_operand.hbm [shape: f32[16,128], index: 5, kind: output, shape index: {}]  }
   0x1   :  { %11 = vsyncpa [#allocation5], 0  ;;  %s376_s18 = smov [#allocation3]   ;;  %s328_s22 = scalar_lea.hbm %s451_s1, 1024 }
   0x2   :  { %s19_s19 = sshll.u32 %s376_s18, 4  ;;  %p329_p0 = scmp.ne.s32.totalorder %s451_s1, %s328_s22  ;;  %s20_s19 = int_to_ptr.vmem [resolvable:$true] %s19_s19 }
   0x3   :  { %p332_p1 = scmp.lt.u32.totalorder %s328_s22, %s451_s1 }
   0x5   :  { %p334_p2 = pnand %p332_p1, %p329_p0 }
   0x7   :  { %337 = shalt.err (!%p334_p2)
}
   0x8   :  { %s338_s27 = scalar_lea.vmem %s20_s19, 1024  ;;  %p343_p4 = scmp.lt.s32.totalorder %s20_s19, %s20_s19 }
   0x9   :  { %p339_p3 = scmp.ne.s32.totalorder %s20_s19, %s338_s27  ;;  %p344_p5 = scmp.lt.s32.totalorder %s338_s27, %s338_s27 }
   0xb   :  { %p345_p6 = por %p344_p5, %p343_p4 }
   0xd   :  { %p346_p7 = pnand %p345_p6, %p339_p3 }
   0xf   :  { %349 = shalt.err (!%p346_p7)
}
  0x10   :  { %s377_s28 = smov 64   ;;  %s378_s29 = smov 4  }
  0x11   :  { %25 = dma.hbm_to_vmem [thread:$0]  %s451_s1, 1024, %s20_s19, [#allocation4], %s377_s28, %s377_s28, %s378_s29  }
  0x12   :  { %372 = dma.done.wait [#allocation4], 1024  }
  0x13   :  { %373 = vsyncadd [#allocation4], 4294966272  ;;  %v379_v0 = vmov 0.0   ;;  %vm380_vm0 = vmmov 0   ;;  %v318_v1 = vld [vmem:[#allocation3] sm:$0xff]   ;;  %v319_v2 = vld [vmem:[#allocation3 + $0x8] sm:$0xff]  }
  0x14   :  { %280 = vmatprep.subr.bf16.mxu1 %v379_v0  ;;  %300 = vmatprep.subr.bf16.mxu0 %v379_v0  ;;  %vm189_vm1 = vcmask 1043456   ;;  %v320_v3 = vld [vmem:[#allocation3 + $0x10] sm:$0xff]   ;;  %v179_v4 = vld [vmem:[%s454_s4] sm:$0xf]  ;;  %vm185_vm2 = vcmask 64512   ;;  %v321_v7 = vld [vmem:[#allocation3 + $0x18] sm:$0xff]  }
  0x15   :  { %302 = vmatprep.mubr.msk.bf16.mxu0 %vm380_vm0, %v379_v0  ;;  %296 = vmatprep.mubr.msk.bf16.mxu1 %vm380_vm0, %v379_v0  ;;  %v191_v5 = vsel %vm189_vm1, %v179_v4, 0  ;;  %v326_v6 = vld [vmem:[%s453_s3] sm:$0xff]   ;;  %v323_v9 = vld [vmem:[#allocation3 + $0x28] sm:$0xff]   ;;  %v324_v10 = vld [vmem:[#allocation3 + $0x30] sm:$0xff]   ;;  %s381_s12 = smov [#allocation6]  }
  0x16   :  { %281 = vmatpush3.bf16.msra.mxu1 %v318_v1  ;;  %301 = vmatpush3.bf16.msra.mxu0 %v191_v5  ;;  %v322_v8 = vld [vmem:[#allocation3 + $0x20] sm:$0xff]   ;;  %v325_v11 = vld [vmem:[#allocation3 + $0x38] sm:$0xff]   ;;  %s245_s13 = sshll.u32 %s381_s12, 4  ;;  %s246_s13 = int_to_ptr.vmem [resolvable:$true] %s245_s13 }
  0x17   :  { %282 = vmatprep.subr.bf16.mxu1 %v379_v0  ;;  %v327_v12 = vld [vmem:[%s450_s0] sm:$0xff]   ;;  %s350_s0 = scalar_lea.vmem %s246_s13, 256  ;;  %p355_p9 = scmp.lt.s32.totalorder %s246_s13, %s246_s13 }
  0x18   :  { %v266_v17 = vld [vmem:[%s452_s2] ss:$0 sm:$0xff]  ;;  %p351_p8 = scmp.ne.s32.totalorder %s246_s13, %s350_s0  ;;  %p356_p10 = scmp.lt.s32.totalorder %s350_s0, %s350_s0 }
  0x19   :  { %303 = vmatmul.mubr.msk.bf16.vlgmr.msra.gmra.mrb[0].mxu0 %vm185_vm2, %v326_v6 }
  0x1a   :  { %283 = vmatpush3.bf16.msra.mxu1 %v319_v2  ;;  %p357_p11 = por %p356_p10, %p355_p9 }
  0x1b   :  { %284 = vmatprep.subr.bf16.mxu1 %v379_v0 }
  0x1c   :  { %p358_p12 = pnand %p357_p11, %p351_p8 }
  0x1e   :  { %285 = vmatpush3.bf16.msra.mxu1 %v320_v3 }
  0x1f   :  { %286 = vmatprep.subr.bf16.mxu1 %v379_v0 }
  0x22   :  { %287 = vmatpush3.bf16.msra.mxu1 %v321_v7 }
  0x23   :  { %288 = vmatprep.subr.bf16.mxu1 %v379_v0 }
  0x26   :  { %289 = vmatpush3.bf16.msra.mxu1 %v322_v8 }
  0x27   :  { %290 = vmatprep.subr.bf16.mxu1 %v379_v0 }
  0x2a   :  { %291 = vmatpush3.bf16.msra.mxu1 %v323_v9 }
  0x2b   :  { %292 = vmatprep.subr.bf16.mxu1 %v379_v0 }
  0x2e   :  { %293 = vmatpush3.bf16.msra.mxu1 %v324_v10 }
  0x2f   :  { %294 = vmatprep.subr.bf16.mxu1 %v379_v0 }
  0x32   :  { %295 = vmatpush3.bf16.msra.mxu1 %v325_v11 }
  0x35   :  { %297 = vmatmul.mubr.bf16.vlgmr.msra.gmra.mrb[0].mxu1 %v327_v12 }
  0xec   :  { %v227_v13 = vpop.f32.mrb[0].mxu0 }
  0xed   :  { %v304_v14 = vpop.f32.mrb[1].mxu0 }
  0xee   :  { %v230_v15 = vpop.f32.mrb[2].mxu0 }
  0xef   :  { %v305_v16 = vpop.f32.mrb[3].mxu0 }
 0x108   :  { %v142_v18 = vpop.f32.mrb[0].mxu1 }
 0x109   :  { %v160_v19 = vadd.f32 %v266_v17, %v142_v18  ;;  %v298_v20 = vpop.f32.mrb[1].mxu1 }
 0x10a   :  { %v145_v21 = vpop.f32.mrb[2].mxu1 }
 0x10b   :  { %v236_v22 = vadd.f32 %v227_v13, %v160_v19  ;;  %v161_v23 = vadd.f32 %v266_v17, %v145_v21  ;;  %v299_v24 = vpop.f32.mrb[3].mxu1 }
 0x10d   :  { %238 = vst [vmem:[#allocation6] sm:$0xff] %v236_v22  ;;  %v237_v25 = vadd.f32 %v230_v15, %v161_v23 }
 0x10f   :  { %239 = vst [vmem:[#allocation6 + $0x8] sm:$0xff] %v237_v25 }
 0x110   :  { %361 = shalt.err (!%p358_p12)
}
 0x111   :  { %s362_s15 = scalar_lea.hbm %s455_s5, 256 }
 0x112   :  { %p363_p13 = scmp.ne.s32.totalorder %s455_s5, %s362_s15  ;;  %p366_p0 = scmp.lt.u32.totalorder %s362_s15, %s455_s5 }
 0x114   :  { %p368_p1 = pnand %p366_p0, %p363_p13 }
 0x116   :  { %371 = shalt.err (!%p368_p1)
}
 0x117   :  { %s382_s20 = smov 128   ;;  %s383_s21 = smov 8  }
 0x118   :  { %251 = dma.vmem_to_hbm [thread:$0]  %s246_s13, 256, %s455_s5, [#allocation5], %s382_s20, %s382_s20, %s383_s21  }
 0x119   :  { %374 = dma.done.wait [#allocation5], 256  }
 0x11a   :  { %375 = vsyncadd [#allocation5], 4294967040 }
 0x11b   :  { %255 = vsyncpa [#allocation4], 1 }
 0x11c   :  { %256 = vsyncpa [#allocation5], 1 }

</bundles_post_ra>
